<compile_context>
chip_gen: v7x
topology: tpu7x:2x2x1
jax: 0.10.0
libtpu: 0.0.40
codegen_flags: <defaults>
</compile_context>

<pallas_src>
import functools

import jax
import jax.numpy as jnp
import numpy as np
from jax.experimental import pallas as pl
from jax.experimental.pallas import tpu as pltpu

_MAX_LANE_CHUNKS = 64  # cap per-step static unroll (ts <= 64 * 128 = 8192)


def _metamodel_kernel(x_ref, w_ref, b_ref, out_ref, acc_ref, *, inv_hw,
                      lane_chunks):
    # x_ref   : (tb, C, ts) f32  -- lane-dense spatial tile (ts = 128*lane_chunks)
    # w_ref   : (C, O)      f32  -- mean-over-models head weights
    # b_ref   : (1, O)      f32  -- mean-over-models head bias
    # out_ref : (tb, O)     f32  -- sigmoid(mean_m logits_m)
    # acc_ref : (tb, C, 128) f32 VMEM scratch -- running 128-lane GAP partials
    j = pl.program_id(1)

    @pl.when(j == 0)
    def _():
        acc_ref[...] = jnp.zeros_like(acc_ref)

    # Steady state: pure-VPU accumulation of 128-wide lane partials.  No
    # per-step cross-lane reduce -> XLU stays idle and the loop is HBM-bound.
    part = x_ref[:, :, pl.ds(0, 128)]
    for k in range(1, lane_chunks):
        part = part + x_ref[:, :, pl.ds(k * 128, 128)]
    acc_ref[...] += part

    @pl.when(j == pl.num_programs(1) - 1)
    def _():
        # Single XLU lane reduce + true-mean scale, once per batch tile.
        pooled = jnp.sum(acc_ref[...], axis=-1) * inv_hw          # (tb, C)
        logits = jnp.dot(pooled, w_ref[...],
                         preferred_element_type=jnp.float32) + b_ref[...]
        out_ref[...] = jax.nn.sigmoid(logits)


def _largest_div_mult128(hw, hi, lo):
    """Largest divisor d of hw with d % 128 == 0 and lo <= d <= hi, else None."""
    if hw % 128 != 0:
        return None
    q = hw // 128
    best = None
    k = 1
    while k * k <= q:
        if q % k == 0:
            for d in (k, q // k):
                cand = d * 128
                if lo <= cand <= hi and (best is None or cand > best):
                    best = cand
        k += 1
    return best


def _choose_tiles(B, C, HW, block_budget):
    """Pick (tb, ts): maximize per-step DMA bytes within the VMEM byte budget."""
    hw128 = ((HW + 127) // 128) * 128
    if B % 8 == 0:
        cands = [d for d in range(8, min(B, 256) + 1, 8) if B % d == 0]
        if B >= 16:
            # keep >= 2 batch tiles so the batch axis can split across v7x's 2 TCs
            pref = [d for d in cands if B // d >= 2]
            cands = pref or cands
    else:
        cands = [B]

    best = None  # (per_step_bytes, tb, ts)
    for tb in cands:
        scratch = tb * C * 128 * 4                     # GAP partial scratch
        avail = block_budget - scratch
        if avail <= 0:
            continue
        ts_cap = avail // (8 * tb * C)                 # 2 buffers * 4 bytes
        ts_cap = (ts_cap // 128) * 128
        ts_cap = min(ts_cap, hw128, 128 * _MAX_LANE_CHUNKS)
        if ts_cap < 128:
            continue
        key = (tb * C * ts_cap * 4, tb, ts_cap)
        if best is None or key > best:
            best = key
    if best is None:                                   # extreme shapes fallback
        return (8 if B % 8 == 0 else B), 128
    return best[1], best[2]


def slice_selecter_metamodel(images, weights, biases):
    """images: (B, C, H, W) f32; weights: (M, C, O) f32; biases: (M, 1, O) f32."""
    B, C, H, W = images.shape
    M, _, O = weights.shape
    HW = H * W

    # --- generation-aware VMEM budget --------------------------------------
    try:
        vmem_cap = int(pltpu.get_tpu_info().vmem_capacity_bytes)
    except Exception:
        vmem_cap = 64 * 1024 * 1024                    # conservative (v7x-sized)
    vmem_limit = max(32 * 1024 * 1024,
                     min(vmem_cap - 8 * 1024 * 1024, 96 * 1024 * 1024))
    block_budget = int(vmem_limit * 0.6)               # 2x x-block + GAP scratch

    tb, ts = _choose_tiles(B, C, HW, block_budget)

    # --- make the spatial extent divisible by ts ----------------------------
    if HW % ts == 0:
        hw_p = HW
    else:
        d = _largest_div_mult128(HW, hi=ts, lo=max(128, ts // 2))
        if d is not None:
            ts = d                                     # exact-dividing tile
            hw_p = HW
        else:
            hw_p = ((HW + ts - 1) // ts) * ts          # zero-pad (sum-safe)

    # Lane-dense layout: the reduced (spatial) axis is the last dim.
    x = images.reshape(B, C, HW)
    if hw_p != HW:
        x = jnp.pad(x, ((0, 0), (0, 0), (0, hw_p - HW)))

    # mean over models of affine heads == one head with mean weights / bias.
    w_mean = jnp.mean(weights, axis=0)                 # (C, O)
    b_mean = jnp.mean(biases, axis=0)                  # (1, O)

    grid = (B // tb, hw_p // ts)
    lane_chunks = ts // 128
    kernel = functools.partial(_metamodel_kernel,
                               inv_hw=float(1.0 / HW),
                               lane_chunks=lane_chunks)

    flops = B * C * hw_p + 2 * B * C * O
    bytes_accessed = 4 * (B * C * hw_p + C * O + O + B * O)

    return pl.pallas_call(
        kernel,
        out_shape=jax.ShapeDtypeStruct((B, O), jnp.float32),
        grid_spec=pltpu.PrefetchScalarGridSpec(
            num_scalar_prefetch=0,
            grid=grid,
            in_specs=[
                pl.BlockSpec((tb, C, ts), lambda i, j: (i, 0, j)),
                pl.BlockSpec((C, O), lambda i, j: (0, 0)),
                pl.BlockSpec((1, O), lambda i, j: (0, 0)),
            ],
            out_specs=pl.BlockSpec((tb, O), lambda i, j: (i, 0)),
            scratch_shapes=[pltpu.VMEM((tb, C, 128), jnp.float32)],
        ),
        compiler_params=pltpu.CompilerParams(
            dimension_semantics=("parallel", "arbitrary"),
            vmem_limit_bytes=int(vmem_limit)),
        cost_estimate=pl.CostEstimate(
            flops=flops, transcendentals=B * O, bytes_accessed=bytes_accessed),
    )(x, w_mean, b_mean)


def reference_forward(images, weights, biases):
    """Pure-JAX reference mirroring the PyTorch metamodel forward."""
    pooled = jnp.mean(images, axis=(2, 3))                           # (B, C)
    logits = jnp.einsum("bc,mco->bmo", pooled, weights) + biases[:, 0, :][None]
    mean_logits = jnp.mean(logits, axis=1)                           # over models
    return jax.nn.sigmoid(mean_logits)


def _check(B, C, H, W, M, O, seed):
    key = jax.random.PRNGKey(seed)
    k_img, k_w, k_b = jax.random.split(key, 3)
    images = jax.random.normal(k_img, (B, C, H, W), dtype=jnp.float32)
    weights = jax.random.normal(k_w, (M, C, O), dtype=jnp.float32) * 0.1
    biases = jax.random.normal(k_b, (M, 1, O), dtype=jnp.float32) * 0.1

    out = slice_selecter_metamodel(images, weights, biases)
    out = jax.block_until_ready(out)

    ref = reference_forward(images, weights, biases)
    np.testing.assert_allclose(np.asarray(out), np.asarray(ref),
                               rtol=1e-5, atol=1e-5)
    assert out.shape == (B, O) and out.dtype == jnp.float32


if __name__ == "__main__":
    # Small canonical shapes (NCHW images, 3 sub-models, 8 logits).
    _check(B=2, C=4, H=16, W=16, M=3, O=8, seed=0)
    # Larger shapes exercising both grid axes and multi-chunk accumulation.
    _check(B=16, C=8, H=64, W=64, M=3, O=8, seed=0)

    print("KERNEL_OK")
</pallas_src>

<mosaic_0001>
module attributes {stable_mosaic.version = 11 : i64} {
  func.func @_metamodel_kernel(%arg0: i32, %arg1: i32, %arg2: memref<2x4x256xf32, #tpu.memory_space<vmem>>, %arg3: memref<4x8xf32, #tpu.memory_space<vmem>>, %arg4: memref<1x8xf32, #tpu.memory_space<vmem>>, %arg5: memref<2x8xf32, #tpu.memory_space<vmem>>, %arg6: memref<2x4x128xf32, #tpu.memory_space<vmem>>) attributes {dimension_semantics = [#tpu.dimension_semantics<parallel>, #tpu.dimension_semantics<arbitrary>], iteration_bounds = array<i64: 1, 1>, scalar_prefetch = 0 : i64, scratch_operands = 1 : i64, tpu.core_type = #tpu.core_type<tc>, window_params = [{transform_indices = @transform_0, window_bounds = array<i64: 2, 4, 256>}, {pipeline_mode = #tpu.pipeline_mode<synchronous>, transform_indices = @transform_1, window_bounds = array<i64: 4, 8>}, {pipeline_mode = #tpu.pipeline_mode<synchronous>, transform_indices = @transform_2, window_bounds = array<i64: 1, 8>}, {transform_indices = @transform_3, window_bounds = array<i64: 2, 8>}]} {
    %c0_i32 = arith.constant 0 : i32
    %0 = arith.cmpi eq, %arg1, %c0_i32 : i32
    %1 = arith.extui %0 : i1 to i32
    %c0_i32_0 = arith.constant 0 : i32
    %2 = arith.cmpi ne, %1, %c0_i32_0 : i32
    scf.if %2 {
      %cst = arith.constant 0.000000e+00 : f32
      %12 = vector.broadcast %cst : f32 to vector<2x4x128xf32>
      %c0_13 = arith.constant 0 : index
      %c0_14 = arith.constant 0 : index
      %c0_15 = arith.constant 0 : index
      %13 = vector.load %arg6[%c0_13, %c0_14, %c0_15] : memref<2x4x128xf32, #tpu.memory_space<vmem>>, vector<2x4x128xf32>
      tpu.vector_store %arg6[%c0_13, %c0_14, %c0_15], %12 {strides = array<i32>} : memref<2x4x128xf32, #tpu.memory_space<vmem>>, vector<2x4x128xf32>,
    } else {
    }
    %c0 = arith.constant 0 : index
    %c0_1 = arith.constant 0 : index
    %c0_2 = arith.constant 0 : index
    %3 = vector.load %arg2[%c0, %c0_1, %c0_2] : memref<2x4x256xf32, #tpu.memory_space<vmem>>, vector<2x4x128xf32>
    %c0_3 = arith.constant 0 : index
    %c0_4 = arith.constant 0 : index
    %c128 = arith.constant 128 : index
    %4 = vector.load %arg2[%c0_3, %c0_4, %c128] : memref<2x4x256xf32, #tpu.memory_space<vmem>>, vector<2x4x128xf32>
    %5 = arith.addf %3, %4 : vector<2x4x128xf32>
    %c0_5 = arith.constant 0 : index
    %c0_6 = arith.constant 0 : index
    %c0_7 = arith.constant 0 : index
    %6 = vector.load %arg6[%c0_5, %c0_6, %c0_7] : memref<2x4x128xf32, #tpu.memory_space<vmem>>, vector<2x4x128xf32>
    %7 = arith.addf %6, %5 : vector<2x4x128xf32>
    %c0_8 = arith.constant 0 : index
    %c0_9 = arith.constant 0 : index
    %c0_10 = arith.constant 0 : index
    %8 = vector.load %arg6[%c0_8, %c0_9, %c0_10] : memref<2x4x128xf32, #tpu.memory_space<vmem>>, vector<2x4x128xf32>
    tpu.vector_store %arg6[%c0_8, %c0_9, %c0_10], %7 {strides = array<i32>} : memref<2x4x128xf32, #tpu.memory_space<vmem>>, vector<2x4x128xf32>,
    %c0_i32_11 = arith.constant 0 : i32
    %9 = arith.cmpi eq, %arg1, %c0_i32_11 : i32
    %10 = arith.extui %9 : i1 to i32
    %c0_i32_12 = arith.constant 0 : i32
    %11 = arith.cmpi ne, %10, %c0_i32_12 : i32
    scf.if %11 {
      %c0_13 = arith.constant 0 : index
      %c0_14 = arith.constant 0 : index
      %c0_15 = arith.constant 0 : index
      %12 = vector.load %arg6[%c0_13, %c0_14, %c0_15] : memref<2x4x128xf32, #tpu.memory_space<vmem>>, vector<2x4x128xf32>
      %cst = arith.constant dense<0.000000e+00> : vector<2x4xf32>
      %13 = vector.multi_reduction <add>, %12, %cst [2] : vector<2x4x128xf32> to vector<2x4xf32>
      %cst_16 = arith.constant 3.906250e-03 : f32
      %14 = vector.broadcast %cst_16 : f32 to vector<2x4xf32>
      %15 = arith.mulf %13, %14 : vector<2x4xf32>
      %c0_17 = arith.constant 0 : index
      %c0_18 = arith.constant 0 : index
      %16 = vector.load %arg3[%c0_17, %c0_18] : memref<4x8xf32, #tpu.memory_space<vmem>>, vector<4x8xf32>
      %cst_19 = arith.constant dense<0.000000e+00> : vector<2x8xf32>
      %17 = tpu.matmul %15, %16, %cst_19 {dimension_numbers = #tpu.dot_dimension_numbers<[1], [0], [0], [1], [0, 0, 1, 1], [], []>} : vector<2x4xf32>, vector<4x8xf32>, vector<2x8xf32> -> vector<2x8xf32>
      %c0_20 = arith.constant 0 : index
      %c0_21 = arith.constant 0 : index
      %18 = vector.load %arg4[%c0_20, %c0_21] : memref<1x8xf32, #tpu.memory_space<vmem>>, vector<1x8xf32>
      %19 = vector.broadcast %18 : vector<1x8xf32> to vector<2x8xf32>
      %20 = arith.addf %17, %19 : vector<2x8xf32>
      %21 = arith.negf %20 : vector<2x8xf32>
      %22 = math.exp %21 : vector<2x8xf32>
      %cst_22 = arith.constant 1.000000e+00 : f32
      %23 = vector.broadcast %cst_22 : f32 to vector<2x8xf32>
      %24 = arith.addf %23, %22 : vector<2x8xf32>
      %25 = arith.divf %23, %24 : vector<2x8xf32>
      %c0_23 = arith.constant 0 : index
      %c0_24 = arith.constant 0 : index
      %26 = vector.load %arg5[%c0_23, %c0_24] : memref<2x8xf32, #tpu.memory_space<vmem>>, vector<2x8xf32>
      tpu.vector_store %arg5[%c0_23, %c0_24], %25 {strides = array<i32>} : memref<2x8xf32, #tpu.memory_space<vmem>>, vector<2x8xf32>,
    } else {
    }
    return
  }
  func.func @transform_0(%arg0: i32, %arg1: i32) -> (i32, i32, i32) {
    %c0_i32 = arith.constant 0 : i32
    %c0_i32_0 = arith.constant 0 : i32
    return %arg0, %c0_i32, %arg1 : i32, i32, i32
  }
  func.func @transform_1(%arg0: i32, %arg1: i32) -> (i32, i32) {
    %c0_i32 = arith.constant 0 : i32
    %c0_i32_0 = arith.constant 0 : i32
    %c0_i32_1 = arith.constant 0 : i32
    return %c0_i32, %c0_i32_0 : i32, i32
  }
  func.func @transform_2(%arg0: i32, %arg1: i32) -> (i32, i32) {
    %c0_i32 = arith.constant 0 : i32
    %c0_i32_0 = arith.constant 0 : i32
    %c0_i32_1 = arith.constant 0 : i32
    return %c0_i32, %c0_i32_0 : i32, i32
  }
  func.func @transform_3(%arg0: i32, %arg1: i32) -> (i32, i32) {
    %c0_i32 = arith.constant 0 : i32
    %c0_i32_0 = arith.constant 0 : i32
    return %arg0, %c0_i32 : i32, i32
  }
}

</mosaic_0001>

<bundles_post_ra>
// kernel: tpu_custom_call.1
= control target key start
LH: loop header
LB: loop body
LE: loop exit
PB: predicated region body
PF: predicated region fallthrough
CT: control target
= control target key end

     0   :  { %8 = vsyncpa [#allocation4], 0  ;;  %s355_s0 = inlined_call_operand.hbm [shape: f32[2,4,256], index: 0, kind: input, shape index: {}]   ;;  %s356_s1 = inlined_call_operand.hbm [shape: f32[4,8], index: 1, kind: input, shape index: {}]   ;;  %s357_s2 = inlined_call_operand.vmem [shape: f32[1,8], index: 2, kind: input, shape index: {}]   ;;  %s358_s3 = inlined_call_operand.hbm [shape: f32[2,8], index: 3, kind: output, shape index: {}]  }
   0x1   :  { %9 = vsyncpa [#allocation7], 0 }
   0x2   :  { %10 = vsyncpa [#allocation5], 0  ;;  %s289_s12 = smov [#allocation3]   ;;  %s217_s16 = scalar_lea.hbm %s355_s0, 256 }
   0x3   :  { %s16_s13 = sshll.u32 %s289_s12, 4  ;;  %p218_p0 = scmp.ne.s32.totalorder %s355_s0, %s217_s16  ;;  %s17_s13 = int_to_ptr.vmem [resolvable:$true] %s16_s13 }
   0x4   :  { %p221_p1 = scmp.lt.u32.totalorder %s217_s16, %s355_s0 }
   0x6   :  { %p223_p2 = pnand %p221_p1, %p218_p0 }
   0x8   :  { %226 = shalt.err (!%p223_p2)
}
   0x9   :  { %s227_s21 = scalar_lea.vmem %s17_s13, 256  ;;  %p232_p4 = scmp.lt.s32.totalorder %s17_s13, %s17_s13 }
   0xa   :  { %p228_p3 = scmp.ne.s32.totalorder %s17_s13, %s227_s21  ;;  %p233_p5 = scmp.lt.s32.totalorder %s227_s21, %s227_s21 }
   0xc   :  { %p234_p6 = por %p233_p5, %p232_p4 }
   0xe   :  { %p235_p7 = pnand %p234_p6, %p228_p3 }
  0x10   :  { %238 = shalt.err (!%p235_p7)
}
  0x11   :  { %s290_s22 = smov 128   ;;  %s291_s23 = smov 8  }
  0x12   :  { %22 = dma.hbm_to_vmem [thread:$0]  %s355_s0, 256, %s17_s13, [#allocation4], %s290_s22, %s290_s22, %s291_s23  }
  0x13   :  { %s292_s26 = smov [#allocation6]   ;;  %s239_s30 = scalar_lea.hbm %s356_s1, 64 }
  0x14   :  { %s29_s27 = sshll.u32 %s292_s26, 4  ;;  %p240_p8 = scmp.ne.s32.totalorder %s356_s1, %s239_s30  ;;  %s30_s27 = int_to_ptr.vmem [resolvable:$true] %s29_s27 }
  0x15   :  { %p243_p9 = scmp.lt.u32.totalorder %s239_s30, %s356_s1 }
  0x17   :  { %p245_p10 = pnand %p243_p9, %p240_p8 }
  0x19   :  { %248 = shalt.err (!%p245_p10)
}
  0x1a   :  { %s249_s8 = scalar_lea.vmem %s30_s27, 64  ;;  %p254_p12 = scmp.lt.s32.totalorder %s30_s27, %s30_s27 }
  0x1b   :  { %p250_p11 = scmp.ne.s32.totalorder %s30_s27, %s249_s8  ;;  %p255_p13 = scmp.lt.s32.totalorder %s249_s8, %s249_s8 }
  0x1d   :  { %p256_p0 = por %p255_p13, %p254_p12 }
  0x1f   :  { %p257_p1 = pnand %p256_p0, %p250_p11 }
  0x21   :  { %260 = shalt.err (!%p257_p1)
}
  0x22   :  { %32 = dma.hbm_to_vmem [thread:$0]  %s356_s1, 64, %s30_s27, [#allocation7]  }
  0x23   :  { %283 = dma.done.wait [#allocation4], 256  }
  0x24   :  { %284 = vsyncadd [#allocation4], 4294967040 }
  0x25   :  { %285 = dma.done.wait [#allocation7], 64  }
  0x26   :  { %286 = vsyncadd [#allocation7], 4294967232  ;;  %v293_v0 = vmov 0.0   ;;  %v47_v1 = vld [vmem:[#allocation3] sm:$0xf]  ;;  %vm64_vm0 = vcmask 1043456   ;;  %v83_v16 = vlaneseq }
  0x27   :  { %45 = vst [vmem:[#allocation2] sm:$0xf] %v293_v0  ;;  %46 = vst [vmem:[#allocation2 + $0x4] sm:$0xf] %v293_v0  ;;  %201 = vmatprep.subr.mxu0 %v293_v0  ;;  %v49_v2 = vld [vmem:[#allocation3 + $0x4] sm:$0xf] }
  0x28   :  { %v48_v3 = vld [vmem:[#allocation3 + $0x8] sm:$0xf]  ;;  %v51_v4 = vadd.f32 %v49_v2, %v47_v1  ;;  %v50_v6 = vld [vmem:[#allocation3 + $0xc] sm:$0xf]  ;;  %v73_v15 = vld [vmem:[#allocation6] sm:$0xf] }
  0x29   :  { %v52_v8 = vadd.f32 %v50_v6, %v48_v3  ;;  %202 = vmatpush3.msk.msra.mxu0 %vm64_vm0, %v73_v15  ;;  %vm294_vm1 = vmmov 0   ;;  %v84_v17 = vand.u32 127, %v83_v16  ;;  %v86_v18 = vshrl.u32 %v83_v16, 7  ;;  %v195_v27 = vld [vmem:[%s357_s2] ss:$0 sm:$0xff]  ;;  %s295_s11 = smov [#allocation8]  }
  0x2a   :  { %203 = vmatprep.mubr.msk.f32.mxu0 %vm294_vm1, %v293_v0  ;;  %vm93_vm2 = vcmask 1041409   ;;  %vm95_vm3 = vcmask 31744   ;;  %s185_s12 = sshll.u32 %s295_s11, 4  ;;  %vm177_vm4 = vcmask 58368   ;;  %s186_s12 = int_to_ptr.vmem [resolvable:$true] %s185_s12 }
  0x2b   :  { %v87_v20 = vsub.s32 %v84_v17, %v86_v18  ;;  %s261_s13 = scalar_lea.vmem %s186_s12, 32  ;;  %p266_p3 = scmp.lt.s32.totalorder %s186_s12, %s186_s12 }
  0x2c   :  { %p262_p2 = scmp.ne.s32.totalorder %s186_s12, %s261_s13  ;;  %p267_p4 = scmp.lt.s32.totalorder %s261_s13, %s261_s13 }
  0x2e   :  { %v53_v5 = vld [vmem:[#allocation2] sm:$0xf]  ;;  %v54_v7 = vld [vmem:[#allocation2 + $0x4] sm:$0xf]  ;;  %p268_p5 = por %p267_p4, %p266_p3 }
  0x2f   :  { %v55_v9 = vadd.f32 %v53_v5, %v51_v4  ;;  %v56_v10 = vadd.f32 %v54_v7, %v52_v8 }
  0x30   :  { %p269_p6 = pnand %p268_p5, %p262_p2 }
  0x31   :  { %57 = vst [vmem:[#allocation2] sm:$0xf] %v55_v9  ;;  %58 = vst [vmem:[#allocation2 + $0x4] sm:$0xf] %v56_v10 }
  0x38   :  { %v62_v11 = vld [vmem:[#allocation2] sm:$0xf]  ;;  %v63_v13 = vld [vmem:[#allocation2 + $0x4] sm:$0xf] }
  0x39   :  { %v65_v12 = vsel %vm64_vm0, %v62_v11, 0.0  ;;  %v68_v14 = vsel %vm64_vm0, %v63_v13, 0.0 }
  0x3a   :  { %66 = vadd.xlane.f32.xlu0 %v65_v12 }
  0x3e   :  { %69 = vadd.xlane.f32.xlu0 %v68_v14 }
  0xc7   :  { %v67_v19 = vpop.xlane.xlu0 %66 }
  0xc8   :  { %v71_v21 = vmul.f32 0.00390625, %v67_v19 }
  0xca   :  { %v88_v24 = vrot.slane %v71_v21, %v87_v20 }
  0xcb   :  { %v70_v22 = vpop.xlane.xlu0 %69 }
  0xcc   :  { %v72_v23 = vmul.f32 0.00390625, %v70_v22 }
  0xce   :  { %v92_v25 = vrot.slane %v72_v23, %v87_v20 }
  0xd0   :  { %v94_v26 = vsel %vm93_vm2, %v92_v25, %v88_v24 }
  0xd1   :  { %204 = vmatmul.mubr.msk.f32.vlgmr.msra.gmra.mrb[0].mxu0 %vm95_vm3, %v94_v26 }
 0x1a4   :  { %v167_v28 = vpop.f32.mrb[0].mxu0 }
 0x1a5   :  { %v168_v29 = vadd.f32 %v195_v27, %v167_v28  ;;  %v205_v30 = vpop.f32.mrb[1].mxu0 }
 0x1a7   :  { %v198_v31 = vmul.f32 -1.442695, %v168_v29 }
 0x1a9   :  { %213 = vpow2.f32 %v198_v31 }
 0x1b3   :  { %v214_v32 = vpop.eup %213 }
 0x1b4   :  { %v174_v33 = vadd.f32 1.0, %v214_v32 }
 0x1b6   :  { %215 = vrcp.f32 %v174_v33 }
 0x1c0   :  { %v216_v34 = vpop.eup %215 }
 0x1c1   :  { %178 = vst.msk [vmem:[#allocation8] sm:$0x3] %vm177_vm4, %v216_v34 }
 0x1c2   :  { %272 = shalt.err (!%p269_p6)
}
 0x1c3   :  { %s273_s15 = scalar_lea.hbm %s358_s3, 32 }
 0x1c4   :  { %p274_p7 = scmp.ne.s32.totalorder %s358_s3, %s273_s15  ;;  %p277_p8 = scmp.lt.u32.totalorder %s273_s15, %s358_s3 }
 0x1c6   :  { %p279_p9 = pnand %p277_p8, %p274_p7 }
 0x1c8   :  { %282 = shalt.err (!%p279_p9)
}
 0x1c9   :  { %188 = dma.vmem_to_hbm [thread:$0]  %s186_s12, 32, %s358_s3, [#allocation5]  }
 0x1ca   :  { %287 = dma.done.wait [#allocation5], 32  }
 0x1cb   :  { %288 = vsyncadd [#allocation5], 4294967264 }
 0x1cc   :  { %192 = vsyncpa [#allocation4], 1 }
 0x1cd   :  { %193 = vsyncpa [#allocation7], 1 }
 0x1ce   :  { %194 = vsyncpa [#allocation5], 1 }

</bundles_post_ra>
